<compile_context>
chip_gen: v7x
topology: tpu7x:2x2x1
jax: 0.10.0
libtpu: 0.0.40
codegen_flags: <defaults>
</compile_context>

<pallas_src>
import functools

import numpy as np
import jax
import jax.numpy as jnp
from jax import lax
from jax.experimental import pallas as pl
from jax.experimental.pallas import tpu as pltpu

EPS = 1e-5
NEG_SLOPE = 0.2


@functools.lru_cache(maxsize=None)
def _roll_sign():
    """Memoized probe for pltpu.roll's rotation direction (runs once).

    Returns -1 if pltpu.roll matches jnp.roll (result[i] = x[i - shift]),
    +1 if the convention is reversed (result[i] = x[i + shift]).
    """
    def k(x_ref, o_ref):
        o_ref[...] = pltpu.roll(x_ref[...], shift=1, axis=1)

    x = jnp.broadcast_to(jnp.arange(128, dtype=jnp.float32), (8, 128))
    out = pl.pallas_call(k, out_shape=jax.ShapeDtypeStruct((8, 128), jnp.float32))(x)
    return -1 if int(out[0, 0]) == 127 else 1


def _make_tap_masks(H, W, Z, S_pad):
    """masks[t, s] == 1.0 iff output voxel s has an in-bounds neighbor for tap t.

    Shape (27, S_pad); lanes s >= H*W*Z (padding) are 0 for every tap.
    """
    S = H * W * Z
    h = np.arange(H)[:, None, None]
    w = np.arange(W)[None, :, None]
    z = np.arange(Z)[None, None, :]
    masks = np.zeros((27, S_pad), np.float32)
    t = 0
    for dh in (-1, 0, 1):
        for dw in (-1, 0, 1):
            for dz in (-1, 0, 1):
                m = ((h + dh >= 0) & (h + dh < H) &
                     (w + dw >= 0) & (w + dw < W) &
                     (z + dz >= 0) & (z + dz < Z))
                masks[t, :S] = m.reshape(-1).astype(np.float32)
                t += 1
    return jnp.asarray(masks)


def _in_lrelu(y, vmask, n_valid):
    """InstanceNorm3d (affine=False, eps=1e-5) over the lane axis + LeakyReLU.

    One-pass statistics (sum, sum of squares); `vmask` (or None) excludes
    padded lanes; `n_valid` is the true spatial size S.
    """
    ym = y if vmask is None else y * vmask
    s1 = jnp.sum(ym, axis=1, keepdims=True)
    s2 = jnp.sum(ym * y, axis=1, keepdims=True)
    inv_n = 1.0 / float(n_valid)
    mean = s1 * inv_n
    var = jnp.maximum(s2 * inv_n - mean * mean, 0.0)
    yn = (y - mean) * lax.rsqrt(var + EPS)
    return jnp.maximum(yn, NEG_SLOPE * yn)


def _region_fusion_kernel(x_ref, mask_ref, w1_ref, w2_ref, w3_ref, o_ref,
                          stacked_ref, *, H, W, Z, S, roll_sign):
    S_pad = x_ref.shape[-1]
    C = w1_ref.shape[0]

    # Lane-validity mask for padded spatial positions (static branch).
    if S_pad != S:
        lane = lax.broadcasted_iota(jnp.int32, (1, S_pad), 1)
        vmask = (lane < S).astype(jnp.float32)
    else:
        vmask = None

    # ---- stage 1: 1x1x1 conv == (C, C0) @ (C0, S) on the MXU (bf16 x bf16) ----
    xb = x_ref[...].astype(jnp.bfloat16)
    y = jnp.dot(w1_ref[...], xb, preferred_element_type=jnp.float32)
    y = _in_lrelu(y, vmask, S)

    # ---- stage 2: 3x3x3 conv (zero pad 1) ----
    # Build the stacked (27*C, S_pad) operand from 27 lane-rolled, boundary-
    # masked views of y (XLU rolls + VPU masks), then ONE K = 27*C matmul.
    masks = mask_ref[...]
    t = 0
    for dh in (-1, 0, 1):
        for dw in (-1, 0, 1):
            for dz in (-1, 0, 1):
                off = dh * (W * Z) + dw * Z + dz   # flattened-S offset of this tap
                if off == 0:
                    shifted = y
                else:
                    # shifted[:, s] = y[:, (s + off) mod S_pad]; wrapped lanes and
                    # row/plane-crossing neighbors are zeroed by the tap mask
                    # (== the conv's zero padding).
                    shifted = pltpu.roll(y, shift=(roll_sign * off) % S_pad, axis=1)
                    shifted = shifted * masks[t:t + 1, :]
                stacked_ref[pl.ds(t * C, C), :] = shifted.astype(jnp.bfloat16)
                t += 1
    y = jnp.dot(w2_ref[...], stacked_ref[...], preferred_element_type=jnp.float32)
    y = _in_lrelu(y, vmask, S)

    # ---- stage 3: 1x1x1 conv ----
    y = jnp.dot(w3_ref[...], y.astype(jnp.bfloat16),
                preferred_element_type=jnp.float32)
    o_ref[...] = _in_lrelu(y, vmask, S).astype(o_ref.dtype)


def region_fusion_laststage_forward(x, params):
    """x: (B, num_cls, in_channel, H, W, Z) -> (B, in_channel, H, W, Z)."""
    B, ncls, cin, H, W, Z = x.shape
    C0 = ncls * cin
    # Biases b1/b2/b3 are intentionally NOT used by the kernel: a per-channel
    # bias right before InstanceNorm(affine=False) cancels exactly.
    w1, b1, w2, b2, w3, b3 = params
    C = w1.shape[0]
    S = H * W * Z
    S_pad = ((S + 127) // 128) * 128  # lane-dense stores, no partial vst
    assert S_pad >= 1 and (W * Z + Z + 1) < S_pad + S, "degenerate volume"

    # torch.reshape(x, (B, -1, H, W, Z)) with spatial flattened: channels on the
    # sublane axis, spatial on the lane axis -> pure reshape, no transposes.
    xf = x.reshape(B, C0, S).astype(jnp.float32)
    if S_pad != S:
        xf = jnp.pad(xf, ((0, 0), (0, 0), (0, S_pad - S)))

    masks = _make_tap_masks(H, W, Z, S_pad)                      # (27, S_pad)
    w1_b = w1.astype(jnp.bfloat16)                               # (C, C0)
    w2_b = jnp.transpose(w2, (1, 0, 2)).reshape(C, 27 * C).astype(jnp.bfloat16)
    w3_b = w3.astype(jnp.bfloat16)                               # (C, C)

    kernel = functools.partial(_region_fusion_kernel, H=H, W=W, Z=Z, S=S,
                               roll_sign=_roll_sign())
    out = pl.pallas_call(
        kernel,
        out_shape=jax.ShapeDtypeStruct((B, C, S_pad), jnp.float32),
        grid_spec=pltpu.PrefetchScalarGridSpec(
            num_scalar_prefetch=0,
            grid=(B,),
            in_specs=[
                pl.BlockSpec((pl.Squeezed(), C0, S_pad), lambda b: (b, 0, 0)),
                pl.BlockSpec((27, S_pad), lambda b: (0, 0)),
                pl.BlockSpec((C, C0), lambda b: (0, 0)),
                pl.BlockSpec((C, 27 * C), lambda b: (0, 0)),
                pl.BlockSpec((C, C), lambda b: (0, 0)),
            ],
            out_specs=pl.BlockSpec((pl.Squeezed(), C, S_pad), lambda b: (b, 0, 0)),
            scratch_shapes=[pltpu.VMEM((27 * C, S_pad), jnp.bfloat16)],
        ),
        compiler_params=pltpu.CompilerParams(
            dimension_semantics=("parallel",),      # B=even keeps both v7x TCs busy
            vmem_limit_bytes=32 * 1024 * 1024),
    )(xf, masks, w1_b, w2_b, w3_b)

    if S_pad != S:
        out = out[:, :, :S]
    return out.reshape(B, C, H, W, Z)


def init_params(key, in_channel, num_cls):
    """Deterministic synthetic weights (Conv3d weights stored as (out,in[,tap]))."""
    C0 = in_channel * num_cls
    C = in_channel
    ks = jax.random.split(key, 6)
    w1 = jax.random.normal(ks[0], (C, C0), jnp.float32) / jnp.sqrt(C0)
    b1 = 0.1 * jax.random.normal(ks[1], (C, 1), jnp.float32)
    w2 = jax.random.normal(ks[2], (27, C, C), jnp.float32) / jnp.sqrt(27 * C)
    b2 = 0.1 * jax.random.normal(ks[3], (C, 1), jnp.float32)
    w3 = jax.random.normal(ks[4], (C, C), jnp.float32) / jnp.sqrt(C)
    b3 = 0.1 * jax.random.normal(ks[5], (C, 1), jnp.float32)
    return (w1, b1, w2, b2, w3, b3)


def ref_forward(x, params):
    """Pure-JAX f32 reference (lax.conv, NCDHW, with biases) for correctness."""
    B, ncls, cin, H, W, Z = x.shape
    C0 = ncls * cin
    w1, b1, w2, b2, w3, b3 = params
    C = w1.shape[0]
    xr = x.reshape(B, C0, H, W, Z)

    def conv(z, w_oidhw, b, padding):
        y = lax.conv_general_dilated(
            z, w_oidhw, window_strides=(1, 1, 1), padding=padding,
            dimension_numbers=("NCDHW", "OIDHW", "NCDHW"))
        return y + b.reshape(1, -1, 1, 1, 1)

    def in_lrelu(y):
        mean = jnp.mean(y, axis=(2, 3, 4), keepdims=True)
        var = jnp.mean((y - mean) ** 2, axis=(2, 3, 4), keepdims=True)
        yn = (y - mean) * lax.rsqrt(var + EPS)
        return jnp.where(yn > 0, yn, NEG_SLOPE * yn)

    w1_c = w1.reshape(C, C0, 1, 1, 1)
    w2_c = jnp.transpose(w2.reshape(3, 3, 3, C, C), (3, 4, 0, 1, 2))
    w3_c = w3.reshape(C, C, 1, 1, 1)

    y = in_lrelu(conv(xr, w1_c, b1, "VALID"))
    y = in_lrelu(conv(y, w2_c, b2, [(1, 1), (1, 1), (1, 1)]))
    y = in_lrelu(conv(y, w3_c, b3, "VALID"))
    return y


def _check(B, num_cls, in_channel, H, W, Z, seed):
    key = jax.random.PRNGKey(seed)
    kx, kp = jax.random.split(key)
    x = jax.random.normal(kx, (B, num_cls, in_channel, H, W, Z), jnp.float32)
    params = init_params(kp, in_channel, num_cls)

    out = jax.block_until_ready(region_fusion_laststage_forward(x, params))
    ref = jax.block_until_ready(ref_forward(x, params))

    assert out.shape == (B, in_channel, H, W, Z), out.shape
    max_err = float(jnp.max(jnp.abs(out - ref)))
    assert jnp.allclose(out, ref, atol=5e-2, rtol=5e-2), max_err


if __name__ == "__main__":
    # Main case: S = 4*4*8 = 128 (exactly lane-dense), B=2 (even -> v7x megacore).
    _check(B=2, num_cls=4, in_channel=16, H=4, W=4, Z=8, seed=0)
    # Padded case: S = 5*5*5 = 125 -> padded to 128 with masked IN statistics.
    _check(B=1, num_cls=2, in_channel=16, H=5, W=5, Z=5, seed=0)
    print("KERNEL_OK")
</pallas_src>

<mosaic_0001>
module attributes {stable_mosaic.version = 11 : i64} {
  func.func @k(%arg0: memref<8x128xf32, #tpu.memory_space<vmem>>, %arg1: memref<8x128xf32, #tpu.memory_space<vmem>>) attributes {dimension_semantics = [], scalar_prefetch = 0 : i64, scratch_operands = 0 : i64, tpu.core_type = #tpu.core_type<tc>} {
    %c0 = arith.constant 0 : index
    %c0_0 = arith.constant 0 : index
    %0 = vector.load %arg0[%c0, %c0_0] : memref<8x128xf32, #tpu.memory_space<vmem>>, vector<8x128xf32>
    %c1_i32 = arith.constant 1 : i32
    %1 = tpu.dynamic_rotate %0 by %c1_i32 dim 1 : vector<8x128xf32>, i32 -> vector<8x128xf32>
    %c0_1 = arith.constant 0 : index
    %c0_2 = arith.constant 0 : index
    %2 = vector.load %arg1[%c0_1, %c0_2] : memref<8x128xf32, #tpu.memory_space<vmem>>, vector<8x128xf32>
    tpu.vector_store %arg1[%c0_1, %c0_2], %1 {strides = array<i32>} : memref<8x128xf32, #tpu.memory_space<vmem>>, vector<8x128xf32>,
    return
  }
}

</mosaic_0001>

<bundles_post_ra>
// kernel: tpu_custom_call.1
= control target key start
LH: loop header
LB: loop body
LE: loop exit
PB: predicated region body
PF: predicated region fallthrough
CT: control target
= control target key end

     0   :  { %6 = vsyncpa [#allocation3], 0  ;;  %s128_s0 = inlined_call_operand.hbm [shape: f32[8,128], index: 0, kind: input, shape index: {}]   ;;  %s129_s1 = inlined_call_operand.hbm [shape: f32[8,128], index: 1, kind: output, shape index: {}]  }
   0x1   :  { %7 = vsyncpa [#allocation4], 0  ;;  %s91_s6 = smov [#allocation2]   ;;  %s43_s10 = scalar_lea.hbm %s128_s0, 128 }
   0x2   :  { %s14_s7 = sshll.u32 %s91_s6, 4  ;;  %p44_p0 = scmp.ne.s32.totalorder %s128_s0, %s43_s10  ;;  %s15_s7 = int_to_ptr.vmem [resolvable:$true] %s14_s7 }
   0x3   :  { %p47_p1 = scmp.lt.u32.totalorder %s43_s10, %s128_s0 }
   0x5   :  { %p49_p2 = pnand %p47_p1, %p44_p0 }
   0x7   :  { %52 = shalt.err (!%p49_p2)
}
   0x8   :  { %s53_s15 = scalar_lea.vmem %s15_s7, 128  ;;  %p58_p4 = scmp.lt.s32.totalorder %s15_s7, %s15_s7 }
   0x9   :  { %p54_p3 = scmp.ne.s32.totalorder %s15_s7, %s53_s15  ;;  %p59_p5 = scmp.lt.s32.totalorder %s53_s15, %s53_s15 }
   0xb   :  { %p60_p6 = por %p59_p5, %p58_p4 }
   0xd   :  { %p61_p7 = pnand %p60_p6, %p54_p3 }
   0xf   :  { %64 = shalt.err (!%p61_p7)
}
  0x10   :  { %17 = dma.hbm_to_vmem [thread:$0]  %s128_s0, 128, %s15_s7, [#allocation3]  }
  0x11   :  { %87 = dma.done.wait [#allocation3], 128  }
  0x12   :  { %88 = vsyncadd [#allocation3], 4294967168  ;;  %v21_v0 = vld [vmem:[#allocation2] sm:$0xff]  ;;  %s92_s18 = smov 1   ;;  %s93_s19 = smov [#allocation5]  }
  0x13   :  { %22 = vrot.lane.b32.xlu0 %v21_v0, %s92_s18  ;;  %s31_s20 = sshll.u32 %s93_s19, 4  ;;  %s32_s20 = int_to_ptr.vmem [resolvable:$true] %s31_s20 }
  0x14   :  { %s65_s21 = scalar_lea.vmem %s32_s20, 128  ;;  %p70_p9 = scmp.lt.s32.totalorder %s32_s20, %s32_s20 }
  0x15   :  { %p66_p8 = scmp.ne.s32.totalorder %s32_s20, %s65_s21  ;;  %p71_p10 = scmp.lt.s32.totalorder %s65_s21, %s65_s21 }
  0x17   :  { %p72_p11 = por %p71_p10, %p70_p9 }
  0x19   :  { %p73_p12 = pnand %p72_p11, %p66_p8 }
  0x85   :  { %v23_v1 = vpop.permute.xlu0 %22 }
  0x86   :  { %24 = vst [vmem:[#allocation5] sm:$0xff] %v23_v1 }
  0x87   :  { %76 = shalt.err (!%p73_p12)
}
  0x88   :  { %s77_s0 = scalar_lea.hbm %s129_s1, 128 }
  0x89   :  { %p78_p13 = scmp.ne.s32.totalorder %s129_s1, %s77_s0  ;;  %p81_p0 = scmp.lt.u32.totalorder %s77_s0, %s129_s1 }
  0x8b   :  { %p83_p1 = pnand %p81_p0, %p78_p13 }
  0x8d   :  { %86 = shalt.err (!%p83_p1)
}
  0x8e   :  { %34 = dma.vmem_to_hbm [thread:$0]  %s32_s20, 128, %s129_s1, [#allocation4]  }
  0x8f   :  { %89 = dma.done.wait [#allocation4], 128  }
  0x90   :  { %90 = vsyncadd [#allocation4], 4294967168 }
  0x91   :  { %38 = vsyncpa [#allocation3], 1 }
  0x92   :  { %39 = vsyncpa [#allocation4], 1 }

</bundles_post_ra>
